<compile_context>
chip_gen: v7x
topology: tpu7x:2x2x1
jax: 0.10.0
libtpu: 0.0.40
codegen_flags: <defaults>
</compile_context>

<pallas_src>
import functools

import jax
import jax.numpy as jnp
from jax.experimental import pallas as pl
from jax.experimental.pallas import tpu as pltpu


def _patch_merging_kernel(even_ref, odd_ref, p_ref, w_ref, o_ref, *,
                          matmul_dtype, eps):
    # even_ref / odd_ref: (th, Wh, 2C) -- lanes ordered [x0|x2] / [x1|x3]
    # p_ref:              (4, 2C)      -- rows [gamma_e, gamma_o, beta_e, beta_o] (f32)
    # w_ref:              (4C, C)      -- rows [0:2C] even-half, [2C:4C] odd-half weights
    # o_ref:              (th, Wh, C)
    th, wh, two_c = even_ref.shape
    c_out = o_ref.shape[-1]
    n = th * wh
    inv_4c = 1.0 / (2.0 * two_c)

    xe = even_ref[...].reshape(n, two_c).astype(jnp.float32)
    xo = odd_ref[...].reshape(n, two_c).astype(jnp.float32)

    # LayerNorm over the virtual 4C feature dim (split across the two halves).
    # Biased variance + eps matches nn.LayerNorm.  Stats kept in f32.
    mean = (jnp.sum(xe, axis=-1, keepdims=True)
            + jnp.sum(xo, axis=-1, keepdims=True)) * inv_4c
    ce = xe - mean
    co = xo - mean
    var = (jnp.sum(ce * ce, axis=-1, keepdims=True)
           + jnp.sum(co * co, axis=-1, keepdims=True)) * inv_4c
    rstd = jax.lax.rsqrt(var + eps)

    ge = p_ref[0:1, :]
    go = p_ref[1:2, :]
    be = p_ref[2:3, :]
    bo = p_ref[3:4, :]
    ne = ce * rstd * ge + be
    no = co * rstd * go + bo

    # out = xn @ W done as two half-K matmuls on the MXU, f32 accumulation;
    # avoids ever concatenating the two halves.
    we = w_ref[0:two_c, :]
    wo = w_ref[two_c:2 * two_c, :]
    acc = jnp.dot(ne.astype(matmul_dtype), we,
                  preferred_element_type=jnp.float32)
    acc = acc + jnp.dot(no.astype(matmul_dtype), wo,
                        preferred_element_type=jnp.float32)
    o_ref[...] = acc.reshape(th, wh, c_out).astype(o_ref.dtype)


@functools.partial(jax.jit, static_argnames=("target_tokens", "matmul_dtype",
                                              "vmem_limit_bytes", "eps"))
def patch_merging_forward(x, gamma, beta, weight, *, target_tokens=2048,
                          matmul_dtype=None,
                          vmem_limit_bytes=64 * 1024 * 1024, eps=1e-5):
    """x: (B, C, H, W); gamma/beta: (4C,); weight: (C, 4C)  [PyTorch layout].

    Returns (B, (H//2)*(W//2), C).
    """
    B, C, H, W = x.shape
    assert H % 2 == 0 and W % 2 == 0, (H, W)
    Hh, Wh = H // 2, W // 2
    four_c = 4 * C

    if matmul_dtype is None:
        matmul_dtype = jnp.bfloat16 if x.dtype == jnp.bfloat16 else jnp.float32

    # ---- single layout change on the XLA side: NCHW -> NHWC. ----
    xp = jnp.transpose(x, (0, 2, 3, 1))            # (B, H, W, C)  (one HBM pass)
    xv = xp.reshape(B, Hh, 2, Wh, 2 * C)           # free reinterpretation

    # Lane ordering the kernel sees:
    #   even rows (ph=0): [x0 | x2]     odd rows (ph=1): [x1 | x3]
    # Permute LN params and weight rows once, at trace time, to match.
    g = gamma.astype(jnp.float32)
    b = beta.astype(jnp.float32)
    ge = jnp.concatenate([g[0 * C:1 * C], g[2 * C:3 * C]])
    go = jnp.concatenate([g[1 * C:2 * C], g[3 * C:4 * C]])
    be = jnp.concatenate([b[0 * C:1 * C], b[2 * C:3 * C]])
    bo = jnp.concatenate([b[1 * C:2 * C], b[3 * C:4 * C]])
    ln_p = jnp.stack([ge, go, be, bo], axis=0)                    # (4, 2C)

    w_t = weight.T.astype(matmul_dtype)                           # (4C, C)
    w_perm = jnp.concatenate([w_t[0 * C:1 * C], w_t[2 * C:3 * C],   # even half
                              w_t[1 * C:2 * C], w_t[3 * C:4 * C]],  # odd half
                             axis=0)                              # (4C, C)

    # ---- row-tile selection: big tiles (mem-bound kernel), VMEM-budgeted. ----
    itm = jnp.dtype(x.dtype).itemsize
    # per row of tokens (Wh tokens): double-buffered in/out blocks + f32 temps.
    io_per_row = Wh * (2 * (2 * C) * itm + C * itm) * 2
    tmp_per_row = Wh * 8 * (2 * C) * 4
    fixed = four_c * C * jnp.dtype(matmul_dtype).itemsize + 4 * (2 * C) * 4
    budget = max(int(vmem_limit_bytes) - 16 * 1024 * 1024, 8 * 1024 * 1024)
    max_th = max(1, (budget - fixed) // (io_per_row + tmp_per_row))
    th = int(min(Hh, max(1, pl.cdiv(target_tokens, Wh)), max_th))
    grid = (B, pl.cdiv(Hh, th))                    # ragged last row-block is fine

    # NOTE: for stages with C < 128 the output stores are lane-masked; padding
    # the output lanes to 128 is possible but skipped here (extra HBM writes).
    out4 = pl.pallas_call(
        functools.partial(_patch_merging_kernel,
                          matmul_dtype=matmul_dtype, eps=eps),
        out_shape=jax.ShapeDtypeStruct((B, Hh, Wh, C), x.dtype),
        grid_spec=pltpu.PrefetchScalarGridSpec(
            num_scalar_prefetch=0,
            grid=grid,
            in_specs=[
                # even-row parity slice of the (B, Hh, 2, Wh, 2C) view
                pl.BlockSpec((pl.Squeezed(), th, pl.Squeezed(), Wh, 2 * C),
                             lambda bb, ii: (bb, ii, 0, 0, 0)),
                # odd-row parity slice
                pl.BlockSpec((pl.Squeezed(), th, pl.Squeezed(), Wh, 2 * C),
                             lambda bb, ii: (bb, ii, 1, 0, 0)),
                # LN params (grid-invariant; re-fetch skipped by the pipeline)
                pl.BlockSpec((4, 2 * C), lambda bb, ii: (0, 0)),
                # reduction weight, row-permuted (even half | odd half)
                pl.BlockSpec((four_c, C), lambda bb, ii: (0, 0)),
            ],
            out_specs=pl.BlockSpec((pl.Squeezed(), th, Wh, C),
                                   lambda bb, ii: (bb, ii, 0, 0)),
        ),
        compiler_params=pltpu.CompilerParams(
            dimension_semantics=("parallel", "parallel"),
            vmem_limit_bytes=int(vmem_limit_bytes)),
    )(xv, xv, ln_p, w_perm)

    return out4.reshape(B, Hh * Wh, C)


def _reference(x, gamma, beta, weight):
    """Pure-JAX reference for correctness check (mirrors the PyTorch module)."""
    B, C, H, W = x.shape
    xp = jnp.transpose(x, (0, 2, 3, 1))
    x0 = xp[:, 0::2, 0::2, :]
    x1 = xp[:, 1::2, 0::2, :]
    x2 = xp[:, 0::2, 1::2, :]
    x3 = xp[:, 1::2, 1::2, :]
    xc = jnp.concatenate([x0, x1, x2, x3], axis=-1).reshape(B, -1, 4 * C)
    mean = jnp.mean(xc, axis=-1, keepdims=True)
    var = jnp.mean((xc - mean) ** 2, axis=-1, keepdims=True)
    xn = (xc - mean) / jnp.sqrt(var + 1e-5)
    xn = xn * gamma + beta
    return jnp.einsum("blk,ck->blc", xn, weight)


if __name__ == "__main__":
    key = jax.random.PRNGKey(0)
    B, C, H, W = 2, 4, 16, 16                     # dim = C = 4

    k_x, k_w, k_g, k_b = jax.random.split(key, 4)
    x = jax.random.normal(k_x, (B, C, H, W), dtype=jnp.float32)
    # Non-trivial LN params so the parameter/weight-row permutation is exercised.
    gamma = 1.0 + 0.1 * jax.random.normal(k_g, (4 * C,), dtype=jnp.float32)
    beta = 0.1 * jax.random.normal(k_b, (4 * C,), dtype=jnp.float32)
    weight = jax.random.normal(k_w, (C, 4 * C), dtype=jnp.float32) * 0.1

    # f32 path (exact parity with the f32 PyTorch module)
    out = patch_merging_forward(x, gamma, beta, weight)
    jax.block_until_ready(out)
    ref = _reference(x, gamma, beta, weight)
    assert out.shape == (B, (H // 2) * (W // 2), C), out.shape
    assert jnp.allclose(out, ref, atol=1e-4, rtol=1e-4), \
        float(jnp.max(jnp.abs(out - ref)))

    # bf16 activation path (bf16 MXU operands, f32 accumulation)
    x16 = x.astype(jnp.bfloat16)
    out16 = patch_merging_forward(x16, gamma, beta, weight)
    jax.block_until_ready(out16)
    ref16 = _reference(x16.astype(jnp.float32), gamma, beta, weight)
    assert jnp.allclose(out16.astype(jnp.float32), ref16, atol=5e-2, rtol=5e-2), \
        float(jnp.max(jnp.abs(out16.astype(jnp.float32) - ref16)))

    print("KERNEL_OK")
</pallas_src>

<mosaic_0001>
module attributes {stable_mosaic.version = 11 : i64} {
  func.func @_patch_merging_kernel(%arg0: i32, %arg1: i32, %arg2: memref<1x8x1x8x8xf32, #tpu.memory_space<vmem>>, %arg3: memref<1x8x1x8x8xf32, #tpu.memory_space<vmem>>, %arg4: memref<4x8xf32, #tpu.memory_space<vmem>>, %arg5: memref<16x4xf32, #tpu.memory_space<vmem>>, %arg6: memref<1x8x8x4xf32, #tpu.memory_space<vmem>>) attributes {dimension_semantics = [#tpu.dimension_semantics<parallel>, #tpu.dimension_semantics<parallel>], iteration_bounds = array<i64: 2, 1>, scalar_prefetch = 0 : i64, scratch_operands = 0 : i64, tpu.core_type = #tpu.core_type<tc>, window_params = [{transform_indices = @transform_0, window_bounds = array<i64: 1, 8, 1, 8, 8>}, {transform_indices = @transform_1, window_bounds = array<i64: 1, 8, 1, 8, 8>}, {pipeline_mode = #tpu.pipeline_mode<synchronous>, transform_indices = @transform_2, window_bounds = array<i64: 4, 8>}, {pipeline_mode = #tpu.pipeline_mode<synchronous>, transform_indices = @transform_3, window_bounds = array<i64: 16, 4>}, {transform_indices = @transform_4, window_bounds = array<i64: 1, 8, 8, 4>}]} {
    %c0 = arith.constant 0 : index
    %c0_0 = arith.constant 0 : index
    %c0_1 = arith.constant 0 : index
    %c0_2 = arith.constant 0 : index
    %c0_3 = arith.constant 0 : index
    %0 = vector.load %arg2[%c0, %c0_0, %c0_1, %c0_2, %c0_3] : memref<1x8x1x8x8xf32, #tpu.memory_space<vmem>>, vector<1x8x1x8x8xf32>
    %1 = vector.shape_cast %0 : vector<1x8x1x8x8xf32> to vector<8x8x8xf32>
    %2 = vector.shape_cast %1 : vector<8x8x8xf32> to vector<64x8xf32>
    %c0_4 = arith.constant 0 : index
    %c0_5 = arith.constant 0 : index
    %c0_6 = arith.constant 0 : index
    %c0_7 = arith.constant 0 : index
    %c0_8 = arith.constant 0 : index
    %3 = vector.load %arg3[%c0_4, %c0_5, %c0_6, %c0_7, %c0_8] : memref<1x8x1x8x8xf32, #tpu.memory_space<vmem>>, vector<1x8x1x8x8xf32>
    %4 = vector.shape_cast %3 : vector<1x8x1x8x8xf32> to vector<8x8x8xf32>
    %5 = vector.shape_cast %4 : vector<8x8x8xf32> to vector<64x8xf32>
    %cst = arith.constant dense<0.000000e+00> : vector<64xf32>
    %6 = vector.multi_reduction <add>, %2, %cst [1] : vector<64x8xf32> to vector<64xf32>
    %7 = vector.shape_cast %6 : vector<64xf32> to vector<64x1xf32>
    %cst_9 = arith.constant dense<0.000000e+00> : vector<64xf32>
    %8 = vector.multi_reduction <add>, %5, %cst_9 [1] : vector<64x8xf32> to vector<64xf32>
    %9 = vector.shape_cast %8 : vector<64xf32> to vector<64x1xf32>
    %10 = arith.addf %7, %9 : vector<64x1xf32>
    %cst_10 = arith.constant 6.250000e-02 : f32
    %11 = vector.broadcast %cst_10 : f32 to vector<64x1xf32>
    %12 = arith.mulf %10, %11 : vector<64x1xf32>
    %13 = vector.broadcast %12 : vector<64x1xf32> to vector<64x8xf32>
    %14 = arith.subf %2, %13 : vector<64x8xf32>
    %15 = vector.broadcast %12 : vector<64x1xf32> to vector<64x8xf32>
    %16 = arith.subf %5, %15 : vector<64x8xf32>
    %17 = arith.mulf %14, %14 : vector<64x8xf32>
    %cst_11 = arith.constant dense<0.000000e+00> : vector<64xf32>
    %18 = vector.multi_reduction <add>, %17, %cst_11 [1] : vector<64x8xf32> to vector<64xf32>
    %19 = vector.shape_cast %18 : vector<64xf32> to vector<64x1xf32>
    %20 = arith.mulf %16, %16 : vector<64x8xf32>
    %cst_12 = arith.constant dense<0.000000e+00> : vector<64xf32>
    %21 = vector.multi_reduction <add>, %20, %cst_12 [1] : vector<64x8xf32> to vector<64xf32>
    %22 = vector.shape_cast %21 : vector<64xf32> to vector<64x1xf32>
    %23 = arith.addf %19, %22 : vector<64x1xf32>
    %cst_13 = arith.constant 6.250000e-02 : f32
    %24 = vector.broadcast %cst_13 : f32 to vector<64x1xf32>
    %25 = arith.mulf %23, %24 : vector<64x1xf32>
    %cst_14 = arith.constant 9.99999974E-6 : f32
    %26 = vector.broadcast %cst_14 : f32 to vector<64x1xf32>
    %27 = arith.addf %25, %26 : vector<64x1xf32>
    %28 = math.rsqrt %27 : vector<64x1xf32>
    %c0_15 = arith.constant 0 : index
    %c0_16 = arith.constant 0 : index
    %29 = vector.load %arg4[%c0_15, %c0_16] : memref<4x8xf32, #tpu.memory_space<vmem>>, vector<1x8xf32>
    %c1 = arith.constant 1 : index
    %c0_17 = arith.constant 0 : index
    %30 = vector.load %arg4[%c1, %c0_17] : memref<4x8xf32, #tpu.memory_space<vmem>>, vector<1x8xf32>
    %c2 = arith.constant 2 : index
    %c0_18 = arith.constant 0 : index
    %31 = vector.load %arg4[%c2, %c0_18] : memref<4x8xf32, #tpu.memory_space<vmem>>, vector<1x8xf32>
    %c3 = arith.constant 3 : index
    %c0_19 = arith.constant 0 : index
    %32 = vector.load %arg4[%c3, %c0_19] : memref<4x8xf32, #tpu.memory_space<vmem>>, vector<1x8xf32>
    %33 = vector.broadcast %28 : vector<64x1xf32> to vector<64x8xf32>
    %34 = arith.mulf %14, %33 : vector<64x8xf32>
    %35 = vector.broadcast %29 : vector<1x8xf32> to vector<64x8xf32>
    %36 = arith.mulf %34, %35 : vector<64x8xf32>
    %37 = vector.broadcast %31 : vector<1x8xf32> to vector<64x8xf32>
    %38 = arith.addf %36, %37 : vector<64x8xf32>
    %39 = vector.broadcast %28 : vector<64x1xf32> to vector<64x8xf32>
    %40 = arith.mulf %16, %39 : vector<64x8xf32>
    %41 = vector.broadcast %30 : vector<1x8xf32> to vector<64x8xf32>
    %42 = arith.mulf %40, %41 : vector<64x8xf32>
    %43 = vector.broadcast %32 : vector<1x8xf32> to vector<64x8xf32>
    %44 = arith.addf %42, %43 : vector<64x8xf32>
    %c0_20 = arith.constant 0 : index
    %c0_21 = arith.constant 0 : index
    %45 = vector.load %arg5[%c0_20, %c0_21] : memref<16x4xf32, #tpu.memory_space<vmem>>, vector<8x4xf32>
    %c8 = arith.constant 8 : index
    %c0_22 = arith.constant 0 : index
    %46 = vector.load %arg5[%c8, %c0_22] : memref<16x4xf32, #tpu.memory_space<vmem>>, vector<8x4xf32>
    %cst_23 = arith.constant dense<0.000000e+00> : vector<64x4xf32>
    %47 = tpu.matmul %38, %45, %cst_23 {dimension_numbers = #tpu.dot_dimension_numbers<[1], [0], [0], [1], [0, 0, 1, 1], [], []>} : vector<64x8xf32>, vector<8x4xf32>, vector<64x4xf32> -> vector<64x4xf32>
    %cst_24 = arith.constant dense<0.000000e+00> : vector<64x4xf32>
    %48 = tpu.matmul %44, %46, %cst_24 {dimension_numbers = #tpu.dot_dimension_numbers<[1], [0], [0], [1], [0, 0, 1, 1], [], []>} : vector<64x8xf32>, vector<8x4xf32>, vector<64x4xf32> -> vector<64x4xf32>
    %49 = arith.addf %47, %48 : vector<64x4xf32>
    %50 = vector.shape_cast %49 : vector<64x4xf32> to vector<8x8x4xf32>
    %c0_25 = arith.constant 0 : index
    %c0_26 = arith.constant 0 : index
    %c0_27 = arith.constant 0 : index
    %c0_28 = arith.constant 0 : index
    %51 = vector.load %arg6[%c0_25, %c0_26, %c0_27, %c0_28] : memref<1x8x8x4xf32, #tpu.memory_space<vmem>>, vector<1x8x8x4xf32>
    %52 = vector.shape_cast %51 : vector<1x8x8x4xf32> to vector<8x8x4xf32>
    %53 = vector.shape_cast %50 : vector<8x8x4xf32> to vector<1x8x8x4xf32>
    tpu.vector_store %arg6[%c0_25, %c0_26, %c0_27, %c0_28], %53 {strides = array<i32>} : memref<1x8x8x4xf32, #tpu.memory_space<vmem>>, vector<1x8x8x4xf32>,
    return
  }
  func.func @transform_0(%arg0: i32, %arg1: i32) -> (i32, i32, i32, i32, i32) {
    %c0_i32 = arith.constant 0 : i32
    %c0_i32_0 = arith.constant 0 : i32
    %c0_i32_1 = arith.constant 0 : i32
    %c0_i32_2 = arith.constant 0 : i32
    return %arg0, %arg1, %c0_i32, %c0_i32_0, %c0_i32_1 : i32, i32, i32, i32, i32
  }
  func.func @transform_1(%arg0: i32, %arg1: i32) -> (i32, i32, i32, i32, i32) {
    %c1_i32 = arith.constant 1 : i32
    %c0_i32 = arith.constant 0 : i32
    %c0_i32_0 = arith.constant 0 : i32
    %c0_i32_1 = arith.constant 0 : i32
    return %arg0, %arg1, %c1_i32, %c0_i32, %c0_i32_0 : i32, i32, i32, i32, i32
  }
  func.func @transform_2(%arg0: i32, %arg1: i32) -> (i32, i32) {
    %c0_i32 = arith.constant 0 : i32
    %c0_i32_0 = arith.constant 0 : i32
    %c0_i32_1 = arith.constant 0 : i32
    return %c0_i32, %c0_i32_0 : i32, i32
  }
  func.func @transform_3(%arg0: i32, %arg1: i32) -> (i32, i32) {
    %c0_i32 = arith.constant 0 : i32
    %c0_i32_0 = arith.constant 0 : i32
    %c0_i32_1 = arith.constant 0 : i32
    return %c0_i32, %c0_i32_0 : i32, i32
  }
  func.func @transform_4(%arg0: i32, %arg1: i32) -> (i32, i32, i32, i32) {
    %c0_i32 = arith.constant 0 : i32
    %c0_i32_0 = arith.constant 0 : i32
    %c0_i32_1 = arith.constant 0 : i32
    return %arg0, %arg1, %c0_i32, %c0_i32_0 : i32, i32, i32, i32
  }
}

</mosaic_0001>

<bundles_post_ra>
// kernel: patch_merging_forward.1
= control target key start
LH: loop header
LB: loop body
LE: loop exit
PB: predicated region body
PF: predicated region fallthrough
CT: control target
= control target key end

     0   :  { %s2005_s0 = inlined_call_operand.hbm [shape: f32[2,8,2,8,8], index: 0, kind: input, shape index: {}, may-alias: {0,1}]   ;;  %s2006_s1 = inlined_call_operand.hbm [shape: f32[2,8,2,8,8], index: 1, kind: input, shape index: {}, may-alias: {0,1}]   ;;  %s2007_s2 = inlined_call_operand.hbm [shape: f32[4,8], index: 2, kind: input, shape index: {}]   ;;  %s2008_s3 = inlined_call_operand.hbm [shape: f32[16,4], index: 3, kind: input, shape index: {}]   ;;  %s2009_s4 = inlined_call_operand.hbm [shape: f32[2,8,8,4], index: 4, kind: output, shape index: {}]  }
   0x1   :  { %2022 = sst [smem:[#allocation18_spill]] %s2005_s0 }
   0x2   :  { %2023 = sst [smem:[#allocation19_spill]] %s2007_s2 }
   0x3   :  { %2024 = sst [smem:[#allocation20_spill]] %s2008_s3 }
   0x4   :  { %9 = vsyncpa [#allocation3], 0 }
   0x5   :  { %11 = vsyncpa [#allocation3 + $0x1], 0 }
   0x6   :  { %12 = vsyncpa [#allocation6], 0 }
   0x7   :  { %14 = vsyncpa [#allocation6 + $0x1], 0 }
   0x8   :  { %15 = vsyncpa [#allocation9], 0 }
   0x9   :  { %16 = vsyncpa [#allocation4], 0 }
   0xa   :  { %18 = vsyncpa [#allocation4 + $0x1], 0  ;;  %s1447_s15 = smov 0   ;;  %s1449_s16 = smov 0  }
   0xb   :  { %s1451_s17 = smov 0   ;;  %s1453_s18 = smov 0  }
   0xc   :  { %s1455_s19 = smov 0   ;;  %s1457_s20 = smov 0  }
   0xd LB: > { %s1478_s21 = sadd.s32 4294967295, %s1410_s20   ;;  %s991_s22 = sadd.s32 4294967294, %s1410_s20   ;;  %s1410_s20 = sphi %s1457_s20, %s24_s20   ;;  %s1406_s19 = sphi %s1455_s19, %s2058_s19   ;;  %s1402_s18 = sphi %s1453_s18, %s2057_s18   ;;  %s1398_s17 = sphi %s1451_s17, %s2056_s17   ;;  %s1394_s16 = sphi %s1449_s16, %s2055_s16   ;;  %s1390_s15 = sphi %s1447_s15, %s2054_s15  }
   0xe   : > { %p52_p0 = scmp.ne.s32.totalorder %s1398_s17, %s1394_s16  ;;  %p53_p1 = scmp.eq.s32.totalorder %s1410_s20, 0 }
   0xf   : > { %p58_p2 = scmp.ne.s32.totalorder %s1394_s16, %s1390_s15  ;;  %p2010_p3 = scmp.eq.s32.totalorder %s1478_s21, 0 }
  0x10   : > { %p154_p4 = scmp.eq.s32.totalorder %s1478_s21, 1  ;;  %p1489_p5 = por %p53_p1, %p52_p0 }
  0x11   : > { %p160_p6 = scmp.eq.s32.totalorder %s991_s22, 1  ;;  %p1495_p7 = por %p2010_p3, %p58_p2 }
  0x12   : > { %p1499_p8 = por %p154_p4, %p52_p0  ;;  %p992_p10 = scmp.ge.s32.totalorder %s1410_s20, 1 }
  0x13   : > { %s2026_s25 = scalar_select %p1495_p7, 1, 0 }
  0x14   : > { %s2027_s26 = scalar_select %p1499_p8, 1, 0 }
  0x15   : > { %p1503_p9 = por %p160_p6, %p58_p2  ;;  %p167_p11 = scmp.lt.s32.totalorder %s1410_s20, 3 }
  0x16   : > { %s1412_s29 = smov [#allocation7]   ;;  %p1124_p1 = scmp.lt.s32.totalorder %s1410_s20, 2 }
  0x17   : > { %s2028_s27 = scalar_select %p1503_p9, 1, 0 }
  0x18   : > { %p1510_p13 = pnand %p992_p10, %p167_p11  ;;  %s180_s30 = sshll.u32 %s1412_s29, 4  ;;  %s181_s30 = int_to_ptr.vmem [resolvable:$true] %s180_s30 }
  0x19   : > { %2029 = sst [smem:[#allocation16_spill]] %s2028_s27  ;;  %p1519_p4 = pnand %p1124_p1, %p1489_p5 }
  0x1a   : > { %s2030_s28 = scalar_select %p1510_p13, 1, 0 }
  0x1b   : > { %p1104_p0 = pneg %p1510_p13  ;;  %s1413_s6 = smov [#allocation8]  }
  0x1c   : > { %s2031_s5 = scalar_select %p1519_p4, 1, 0 }
  0x1d   : > { %s190_s7 = sshll.u32 %s1413_s6, 4  ;;  %p1525_p2 = pnand %p1104_p0, %p2010_p3  ;;  %s1529_s7 = int_to_ptr.vmem [resolvable:$true] %s190_s7 }
  0x1e   : > { %s2033_s2 = sld [smem:[#allocation19_spill]] }
  0x1f   : > { %p1201_p6 = pneg %p1525_p2 }
  0x24   : > { %s1199_s11 = scalar_lea.hbm %s2033_s2, 64 }
  0x25   : > { %p1200_p5 = scmp.ne.s32.totalorder %s2033_s2, %s1199_s11  ;;  %p1206_p1 = scmp.lt.u32.totalorder %s1199_s11, %s2033_s2 }
  0x27   : > { %p1202_p10 = pnand %p1201_p6, %p1200_p5 }
  0x29   : > { %p1203_p11 = pneg %p1202_p10 }
  0x2b   : > { %p1208_p0 = pnand %p1206_p1, %p1203_p11 }
  0x2d   : > { %1211 = shalt.err (!%p1208_p0)
}
  0x2e   : > { %s1212_s24 = scalar_lea.vmem %s181_s30, 64  ;;  %p1220_p8 = scmp.lt.s32.totalorder %s181_s30, %s181_s30 }
  0x2f   : > { %p1213_p12 = scmp.ne.s32.totalorder %s181_s30, %s1212_s24  ;;  %p1221_p7 = scmp.lt.s32.totalorder %s1212_s24, %s1212_s24 }
  0x31   : > { %p1215_p3 = pnand %p1213_p12, %p1201_p6  ;;  %p1222_p13 = por %p1221_p7, %p1220_p8 }
  0x33   : > { %p1216_p9 = pneg %p1215_p3 }
  0x35   : > { %p1223_p4 = pnand %p1222_p13, %p1216_p9 }
  0x37   : > { %1226 = shalt.err (!%p1223_p4)
}
  0x38   : > { %1107 = dma.hbm_to_vmem [thread:$0]  (!%p1525_p2), %s2033_s2, 64, %s181_s30, [#allocation6]  }
  0x39   : > { %s2034_s3 = sld [smem:[#allocation20_spill]] }
  0x3f   : > { %s1227_s11 = scalar_lea.hbm %s2034_s3, 256 }
  0x40   : > { %p1228_p3 = scmp.ne.s32.totalorder %s2034_s3, %s1227_s11  ;;  %p1234_p9 = scmp.lt.u32.totalorder %s1227_s11, %s2034_s3 }
  0x42   : > { %p1230_p7 = pnand %p1228_p3, %p1201_p6 }
  0x44   : > { %p1231_p8 = pneg %p1230_p7 }
  0x46   : > { %p1236_p12 = pnand %p1234_p9, %p1231_p8 }
  0x48   : > { %1239 = shalt.err (!%p1236_p12)
}
  0x49   : > { %s1240_s30 = scalar_lea.vmem %s1529_s7, 256  ;;  %p1248_p10 = scmp.lt.s32.totalorder %s1529_s7, %s1529_s7 }
  0x4a   : > { %p1241_p13 = scmp.ne.s32.totalorder %s1529_s7, %s1240_s30  ;;  %p1249_p11 = scmp.lt.s32.totalorder %s1240_s30, %s1240_s30 }
  0x4c   : > { %p1243_p4 = pnand %p1241_p13, %p1201_p6  ;;  %p1250_p1 = por %p1249_p11, %p1248_p10 }
  0x4e   : > { %p1244_p5 = pneg %p1243_p4 }
  0x50   : > { %p1251_p0 = pnand %p1250_p1, %p1244_p5 }
  0x52   : > { %1254 = shalt.err (!%p1251_p0)
}
  0x53   : > { %s2016_s24 = smov 128   ;;  %s2018_s29 = smov 8  }
  0x54   : > { %1110 = dma.hbm_to_vmem [thread:$0]  (!%p1525_p2), %s2034_s3, 256, %s1529_s7, [#allocation9], %s2016_s24, %s2016_s24, %s2018_s29  }
  0x55   : > { %s204_s10 = sand.u32 1, %s1398_s17   ;;  %s36_s11 = sadd.s32 1, %s1406_s19 }
  0x56   : > { %s1583_s12 = sshll.u32 %s204_s10, 6  ;;  %p38_p6 = scmp.ge.s32.totalorder %s36_s11, 2 }
  0x57   : > { %s2015_s13 = sshll.u32 %s1406_s19, 11  ;;  %s208_s14 = scalar_lea.vmem [#allocation2], %s1583_s12 }
  0x58   : > { %s218_s22 = sshll.u32 %s208_s14, 4  ;;  %s2060_s11 = smov (%p38_p6, %s36_s11), 0  ;;  %s1596_s22 = int_to_ptr.vmem [resolvable:$true] %s218_s22 }
  0x59   : > { %2035 = sst [smem:[#allocation17_spill]] %s2060_s11  ;;  %s2036_s0 = sld [smem:[#allocation18_spill]] }
  0x5a   : > { %s40_s7 = ssub.s32 %s1406_s19, %s2060_s11  ;;  %s1604_s14 = scalar_lea.sflag [#allocation3], %s204_s10 }
  0x5b   : > { %p1600_p2 = scmp.eq.s32.totalorder %s40_s7, 0  ;;  %p2038_p7 = scmp.ne.s32.totalorder %s2031_s5, 0 }
  0x5d   : > { %p1257_p8 = pneg %p2038_p7 }
  0x5f   : > { %s1594_s6 = scalar_lea.hbm %s2036_s0, %s2015_s13  ;;  %s1260_s13 = scalar_lea.hbm %s2036_s0, 4096 }
  0x60   : > { %s1255_s23 = scalar_lea.hbm %s1594_s6, 1024  ;;  %p1261_p13 = scmp.lt.u32.totalorder %s1594_s6, %s2036_s0 }
  0x61   : > { %p1256_p3 = scmp.ne.s32.totalorder %s1594_s6, %s1255_s23  ;;  %p1262_p4 = scmp.lt.u32.totalorder %s1260_s13, %s1255_s23 }
  0x62   : > { %p1264_p10 = scmp.lt.u32.totalorder %s1255_s23, %s1594_s6 }
  0x63   : > { %p1258_p9 = pnand %p1257_p8, %p1256_p3  ;;  %p1263_p5 = por %p1262_p4, %p1261_p13 }
  0x65   : > { %p1259_p12 = pneg %p1258_p9  ;;  %p1265_p11 = por %p1264_p10, %p1263_p5 }
  0x67   : > { %p1266_p1 = pnand %p1265_p11, %p1259_p12 }
  0x69   : > { %1269 = shalt.err (!%p1266_p1)
}
  0x6a   : > { %s1270_s10 = scalar_lea.vmem %s1596_s22, 1024  ;;  %s1416_s7 = smov [#allocation2]  }
  0x6b   : > { %p1271_p0 = scmp.ne.s32.totalorder %s1596_s22, %s1270_s10  ;;  %s1275_s8 = sshll.u32 %s1416_s7, 4  ;;  %s1276_s8 = int_to_ptr.vmem [resolvable:$false] %s1275_s8 }
  0x6c   : > { %s1277_s24 = scalar_lea.vmem %s1276_s8, 2048  ;;  %p1278_p9 = scmp.lt.s32.totalorder %s1596_s22, %s1276_s8 }
  0x6d   : > { %p1273_p6 = pnand %p1271_p0, %p1257_p8  ;;  %p1279_p13 = scmp.lt.s32.totalorder %s1277_s24, %s1270_s10 }
  0x6f   : > { %p1274_p3 = pneg %p1273_p6  ;;  %p1280_p4 = por %p1279_p13, %p1278_p9 }
  0x71   : > { %p1281_p5 = pnand %p1280_p4, %p1274_p3 }
  0x73   : > { %1284 = shalt.err (!%p1281_p5)
}
  0x74   : > { %s1417_s23 = smov 256   ;;  %s2039_s29 = smov 8  }
  0x75   : > { %s2040_s13 = smov 128   ;;  %s2041_s30 = sadd.s32 1, %s1398_s17 }
  0x76   : > { %1114 = dma.hbm_to_vmem [thread:$0]  (!%p2038_p7), %s1594_s6, 1024, %s1596_s22, %s1604_s14, %s1417_s23, %s2040_s13, %s2039_s29  }
  0x77   : > { %s1640_s10 = scalar_select %p1600_p2, %s1398_s17, %s2041_s30  }
  0x78   : > { %s2042_s7 = sshll.u32 %s1406_s19, 11  ;;  %s232_s2 = scalar_lea.vmem [#allocation5], %s1583_s12 }
  0x79   : > { %s903_s0 = scalar_lea.hbm %s2006_s1, %s2042_s7  ;;  %s243_s3 = sshll.u32 %s232_s2, 4  ;;  %s1650_s3 = int_to_ptr.vmem [resolvable:$true] %s243_s3 }
  0x7a   : > { %s1648_s11 = scalar_lea.hbm %s903_s0, 128  ;;  %s228_s27 = sand.u32 1, %s1410_s20  }
  0x7b   : > { %s1653_s22 = scalar_lea.sflag [#allocation6], %s228_s27  ;;  %s1315_s6 = scalar_lea.hbm %s903_s0, 1152 }
  0x7c   : > { %p1286_p2 = scmp.ne.s32.totalorder %s1648_s11, %s1315_s6  ;;  %s1290_s2 = scalar_lea.hbm %s2006_s1, 4096 }
  0x7d   : > { %p1291_p11 = scmp.lt.u32.totalorder %s1648_s11, %s2006_s1  ;;  %p1292_p1 = scmp.lt.u32.totalorder %s1290_s2, %s1315_s6 }
  0x7e   : > { %p1288_p12 = pnand %p1286_p2, %p1257_p8  ;;  %p1294_p6 = scmp.lt.u32.totalorder %s1315_s6, %s1648_s11 }
  0x7f   : > { %p1293_p0 = por %p1292_p1, %p1291_p11 }
  0x80   : > { %p1289_p10 = pneg %p1288_p12 }
  0x81   : > { %p1295_p3 = por %p1294_p6, %p1293_p0 }
  0x83   : > { %p1296_p9 = pnand %p1295_p3, %p1289_p10 }
  0x85   : > { %1299 = shalt.err (!%p1296_p9)
}
  0x86   : > { %s1300_s0 = scalar_lea.vmem %s1650_s3, 1024  ;;  %s1418_s27 = smov [#allocation5]  }
  0x87   : > { %p1301_p13 = scmp.ne.s32.totalorder %s1650_s3, %s1300_s0  ;;  %s1305_s7 = sshll.u32 %s1418_s27, 4  ;;  %s1306_s7 = int_to_ptr.vmem [resolvable:$false] %s1305_s7 }
  0x88   : > { %s1307_s8 = scalar_lea.vmem %s1306_s7, 2048  ;;  %p1308_p2 = scmp.lt.s32.totalorder %s1650_s3, %s1306_s7 }
  0x89   : > { %p1303_p4 = pnand %p1301_p13, %p1257_p8  ;;  %p1309_p12 = scmp.lt.s32.totalorder %s1307_s8, %s1300_s0 }
  0x8b   : > { %p1304_p5 = pneg %p1303_p4  ;;  %p1310_p11 = por %p1309_p12, %p1308_p2 }
  0x8d   : > { %p1311_p1 = pnand %p1310_p11, %p1304_p5 }
  0x8f   : > { %1314 = shalt.err (!%p1311_p1)
}
  0x90   : > { %1117 = dma.hbm_to_vmem [thread:$0]  (!%p2038_p7), %s1648_s11, 1024, %s1650_s3, %s1653_s22, %s1417_s23, %s2040_s13, %s2039_s29  }
  0x91   : > { %p2043_p8 = scmp.ne.s32.totalorder %s2030_s28, 0 }
  0x92   : > { %s1684_s24 = sand.u32 (!%p2043_p8), 1, %s1394_s16   ;;  %p2044_p10 = scmp.ne.s32.totalorder (!%p2043_p8), %s2026_s25, 0 }
  0x93   : > { %255 = sbr.rel (%p2043_p8) target bundleno = 745 (0x2e9), region = 36  ;;  %s1687_s6 = sshll.u32 (!%p2043_p8), %s1684_s24, 6 }
  0x94   : > { %s258_s5 = scalar_lea.sflag (!%p2043_p8), [#allocation3], %s1684_s24  ;;  %s1691_s9 = scalar_lea.vmem (!%p2043_p8), [#allocation2], %s1687_s6 }
  0x9a   : > { %1369 = dma.done.wait (%p2044_p10), %s258_s5, 1024  }
  0x9b   : > { %1371 = vsyncadd (%p2044_p10), %s258_s5, 4294966272  ;;  %s266_s3 = sand.u32 1, %s1478_s21   ;;  %s1699_s11 = scalar_lea.vmem [#allocation5], %s1687_s6 }
  0x9c   : > { %s267_s28 = scalar_lea.sflag [#allocation6], %s266_s3 }
  0x9d   : > { %1373 = dma.done.wait (%p2044_p10), %s267_s28, 1024  }
  0x9e   : > { %1375 = vsyncadd (%p2044_p10), %s267_s28, 4294966272  ;;  %p2045_p7 = scmp.eq.s32.totalorder %s1478_s21, 0 }
  0xa0   : > { %1377 = dma.done.wait (%p2045_p7), [#allocation6], 64   ;;  %p2046_p0 = pmov %p2045_p7 }
  0xa2   : > { %1379 = vsyncadd (%p2046_p0), [#allocation6], 4294967232  ;;  %p2047_p6 = pmov %p2046_p0 }
  0xa3   : > { %p2048_p3 = pmov %p2046_p0 }
  0xa4   : > { %1381 = dma.done.wait (%p2047_p6), [#allocation9], 256  }
  0xa5   : > { %1383 = vsyncadd (%p2048_p3), [#allocation9], 4294967040  ;;  %vm327_vm0 = vcmask 64512   ;;  %v312_v0 = vld [vmem:[%s1691_s9 + $0x8] sm:$0xff]  ;;  %v311_v1 = vld [vmem:[%s1691_s9] sm:$0xff]  ;;  %vm832_vm1 = vcmask 31744  }
  0xa6   : > { %v320_v2 = vld [vmem:[%s1699_s11 + $0x8] sm:$0xff]  ;;  %v331_v3 = vsel %vm327_vm0, %v312_v0, 0.0  ;;  %v328_v4 = vsel %vm327_vm0, %v311_v1, 0.0  ;;  %v319_v5 = vld [vmem:[%s1699_s11] sm:$0xff]  ;;  %v1722_v8 = vld [vmem:[%s1699_s11 + $0x10] sm:$0xff]  ;;  %s307_s21 = scalar_lea.vmem [#allocation10], %s1687_s6 }
  0xa7   : > { %332 = vadd.xlane.f32.xlu1 %v331_v3  ;;  %329 = vadd.xlane.f32.xlu0 %v328_v4  ;;  %v355_v6 = vsel %vm327_vm0, %v320_v2, 0.0  ;;  %v352_v7 = vsel %vm327_vm0, %v319_v5, 0.0  ;;  %v313_v9 = vld [vmem:[%s1691_s9 + $0x10] sm:$0xff]  ;;  %v358_v10 = vsel %vm327_vm0, %v1722_v8, 0.0  ;;  %v1729_v12 = vld [vmem:[%s1699_s11 + $0x18] sm:$0xff]  ;;  %v1739_v16 = vld [vmem:[%s1699_s11 + $0x20] sm:$0xff] }
  0xa8   : > { %v334_v11 = vsel %vm327_vm0, %v313_v9, 0.0  ;;  %v1732_v13 = vld [vmem:[%s1691_s9 + $0x18] sm:$0xff]  ;;  %v361_v14 = vsel %vm327_vm0, %v1729_v12, 0.0  ;;  %v1742_v17 = vld [vmem:[%s1691_s9 + $0x20] sm:$0xff]  ;;  %v364_v18 = vsel %vm327_vm0, %v1739_v16, 0.0  ;;  %v1749_v20 = vld [vmem:[%s1699_s11 + $0x28] sm:$0xff] }
  0xa9   : > { %v337_v15 = vsel %vm327_vm0, %v1732_v13, 0.0  ;;  %v340_v19 = vsel %vm327_vm0, %v1742_v17, 0.0  ;;  %v1752_v21 = vld [vmem:[%s1691_s9 + $0x28] sm:$0xff]  ;;  %v367_v22 = vsel %vm327_vm0, %v1749_v20, 0.0  ;;  %v1759_v24 = vld [vmem:[%s1699_s11 + $0x30] sm:$0xff]  ;;  %v1769_v28 = vld [vmem:[%s1699_s11 + $0x38] sm:$0xff] }
  0xaa   : > { %v343_v23 = vsel %vm327_vm0, %v1752_v21, 0.0  ;;  %v1762_v25 = vld [vmem:[%s1691_s9 + $0x30] sm:$0xff]  ;;  %v370_v26 = vsel %vm327_vm0, %v1759_v24, 0.0  ;;  %v1772_v29 = vld [vmem:[%s1691_s9 + $0x38] sm:$0xff]  ;;  %v373_v30 = vsel %vm327_vm0, %v1769_v28, 0.0  ;;  %s1035_s25 = sshll.u32 %s1402_s18, 10 }
  0xab   : > { %356 = vadd.xlane.f32.xlu1 %v355_v6  ;;  %353 = vadd.xlane.f32.xlu0 %v352_v7  ;;  %v346_v27 = vsel %vm327_vm0, %v1762_v25, 0.0  ;;  %v349_v31 = vsel %vm327_vm0, %v1772_v29, 0.0  ;;  %s857_s23 = sshll.u32 %s307_s21, 4  ;;  %s1952_s22 = scalar_lea.hbm %s2009_s4, %s1035_s25  ;;  %s1954_s23 = int_to_ptr.vmem [resolvable:$true] %s857_s23 }
  0xac   : > { %s842_s18 = scalar_lea.sflag [#allocation4], %s1684_s24  ;;  %s1316_s14 = scalar_lea.vmem %s1954_s23, 1024 }
  0xad   : > { %p1317_p9 = scmp.ne.s32.totalorder %s1954_s23, %s1316_s14  ;;  %p2049_p13 = scmp.ne.s32.totalorder %s2027_s26, 0 }
  0xae   : > { %s1419_s2 = smov [#allocation10]  }
  0xaf   : > { %359 = vadd.xlane.f32.xlu1 %v358_v10  ;;  %335 = vadd.xlane.f32.xlu0 %v334_v11  ;;  %p1318_p4 = pnand %p1317_p9, %p2049_p13  ;;  %s1320_s12 = sshll.u32 %s1419_s2, 4  ;;  %s1321_s12 = int_to_ptr.vmem [resolvable:$false] %s1320_s12 }
  0xb0   : > { %s1322_s30 = scalar_lea.vmem %s1321_s12, 2048  ;;  %p1323_p2 = scmp.lt.s32.totalorder %s1954_s23, %s1321_s12 }
  0xb1   : > { %p1319_p5 = pneg %p1318_p4  ;;  %p1324_p12 = scmp.lt.s32.totalorder %s1322_s30, %s1316_s14 }
  0xb3   : > { %362 = vadd.xlane.f32.xlu1 %v361_v14  ;;  %338 = vadd.xlane.f32.xlu0 %v337_v15  ;;  %p1325_p11 = por %p1324_p12, %p1323_p2 }
  0xb5   : > { %p1326_p1 = pnand %p1325_p11, %p1319_p5 }
  0xb7   : > { %365 = vadd.xlane.f32.xlu1 %v364_v18  ;;  %341 = vadd.xlane.f32.xlu0 %v340_v19 }
  0xbb   : > { %368 = vadd.xlane.f32.xlu1 %v367_v22  ;;  %344 = vadd.xlane.f32.xlu0 %v343_v23 }
  0xbf   : > { %371 = vadd.xlane.f32.xlu1 %v370_v26  ;;  %347 = vadd.xlane.f32.xlu0 %v346_v27 }
  0xc3   : > { %374 = vadd.xlane.f32.xlu1 %v373_v30  ;;  %350 = vadd.xlane.f32.xlu0 %v349_v31 }
 0x134   : > { %v333_v32 = vpop.xlane.xlu1 %332  ;;  %v330_v33 = vpop.xlane.xlu0 %329 }
 0x138   : > { %v357_v34 = vpop.xlane.xlu1 %356  ;;  %v354_v35 = vpop.xlane.xlu0 %353 }
 0x139   : > { %v377_v36 = vadd.f32 %v357_v34, %v333_v32  ;;  %v376_v37 = vadd.f32 %v354_v35, %v330_v33 }
 0x13b   : > { %v385_v38 = vmul.f32 0.0625, %v377_v36  ;;  %v384_v39 = vmul.f32 0.0625, %v376_v37 }
 0x13c   : > { %v360_v40 = vpop.xlane.xlu1 %359  ;;  %v336_v41 = vpop.xlane.xlu0 %335 }
 0x13d   : > { %v1778_v42 = vsub.f32 %v312_v0, %v385_v38  ;;  %v1780_v43 = vsub.f32 %v320_v2, %v385_v38  ;;  %v1782_v44 = vsub.f32 %v311_v1, %v384_v39  ;;  %v1784_v45 = vsub.f32 %v319_v5, %v384_v39 }
 0x13e   : > { %v378_v46 = vadd.f32 %v360_v40, %v336_v41 }
 0x13f   : > { %v440_v47 = vmul.f32 %v1784_v45, %v1784_v45  ;;  %v408_v48 = vmul.f32 %v1782_v44, %v1782_v44  ;;  %v441_v52 = vmul.f32 %v1780_v43, %v1780_v43  ;;  %v409_v56 = vmul.f32 %v1778_v42, %v1778_v42 }
 0x140   : > { %v386_v49 = vmul.f32 0.0625, %v378_v46  ;;  %v363_v50 = vpop.xlane.xlu1 %362  ;;  %v339_v51 = vpop.xlane.xlu0 %338 }
 0x141   : > { %v448_v53 = vsel %vm327_vm0, %v440_v47, 0.0  ;;  %v416_v54 = vsel %vm327_vm0, %v408_v48, 0.0  ;;  %v379_v55 = vadd.f32 %v363_v50, %v339_v51  ;;  %v451_v60 = vsel %vm327_vm0, %v441_v52, 0.0 }
 0x142   : > { %v1796_v57 = vsub.f32 %v313_v9, %v386_v49  ;;  %v1799_v58 = vsub.f32 %v1722_v8, %v386_v49  ;;  %449 = vadd.xlane.f32.xlu1 %v448_v53  ;;  %417 = vadd.xlane.f32.xlu0 %v416_v54  ;;  %v419_v3 = vsel %vm327_vm0, %v409_v56, 0.0  ;;  %v572_v53 = vld [vmem:[#allocation8] sm:$0xff] }
 0x143   : > { %v387_v59 = vmul.f32 0.0625, %v379_v55  ;;  %1068 = vmatprep.subr.mxu0 %v572_v53 }
 0x144   : > { %v366_v61 = vpop.xlane.xlu1 %365  ;;  %v342_v62 = vpop.xlane.xlu0 %341  ;;  %v442_v63 = vmul.f32 %v1799_v58, %v1799_v58  ;;  %v410_v0 = vmul.f32 %v1796_v57, %v1796_v57  ;;  %1069 = vmatpush3.msra.mxu0 %v572_v53 }
 0x145   : > { %v1807_v1 = vsub.f32 %v1732_v13, %v387_v59  ;;  %v1810_v2 = vsub.f32 %v1729_v12, %v387_v59  ;;  %v380_v4 = vadd.f32 %v366_v61, %v342_v62 }
 0x146   : > { %452 = vadd.xlane.f32.xlu1 %v451_v60  ;;  %420 = vadd.xlane.f32.xlu0 %v419_v3  ;;  %v454_v5 = vsel %vm327_vm0, %v442_v63, 0.0  ;;  %v422_v7 = vsel %vm327_vm0, %v410_v0, 0.0 }
 0x147   : > { %v388_v6 = vmul.f32 0.0625, %v380_v4  ;;  %v443_v8 = vmul.f32 %v1810_v2, %v1810_v2  ;;  %v411_v9 = vmul.f32 %v1807_v1, %v1807_v1 }
 0x148   : > { %v369_v10 = vpop.xlane.xlu1 %368  ;;  %v345_v11 = vpop.xlane.xlu0 %344 }
 0x149   : > { %v1820_v12 = vsub.f32 %v1742_v17, %v388_v6  ;;  %v1823_v13 = vsub.f32 %v1739_v16, %v388_v6  ;;  %v381_v14 = vadd.f32 %v369_v10, %v345_v11  ;;  %v457_v15 = vsel %vm327_vm0, %v443_v8, 0.0 }
 0x14a   : > { %455 = vadd.xlane.f32.xlu1 %v454_v5  ;;  %423 = vadd.xlane.f32.xlu0 %v422_v7  ;;  %v425_v19 = vsel %vm327_vm0, %v411_v9, 0.0 }
 0x14b   : > { %v389_v18 = vmul.f32 0.0625, %v381_v14  ;;  %v444_v22 = vmul.f32 %v1823_v13, %v1823_v13  ;;  %v412_v23 = vmul.f32 %v1820_v12, %v1820_v12 }
 0x14c   : > { %v372_v26 = vpop.xlane.xlu1 %371  ;;  %v348_v17 = vpop.xlane.xlu0 %347 }
 0x14d   : > { %v1832_v27 = vsub.f32 %v1752_v21, %v389_v18  ;;  %v1835_v16 = vsub.f32 %v1749_v20, %v389_v18  ;;  %v382_v30 = vadd.f32 %v372_v26, %v348_v17  ;;  %v460_v31 = vsel %vm327_vm0, %v444_v22, 0.0  ;;  %v1869_v26 = vld [vmem:[#allocation7 + $0x1] ss:$0 sm:$0xff]  ;;  %v1871_v17 = vld [vmem:[#allocation7] ss:$0 sm:$0xff] }
 0x14e   : > { %458 = vadd.xlane.f32.xlu1 %v457_v15  ;;  %426 = vadd.xlane.f32.xlu0 %v425_v19  ;;  %v428_v33 = vsel %vm327_vm0, %v412_v23, 0.0 }
 0x14f   : > { %v390_v32 = vmul.f32 0.0625, %v382_v30  ;;  %v445_v34 = vmul.f32 %v1835_v16, %v1835_v16  ;;  %v413_v35 = vmul.f32 %v1832_v27, %v1832_v27 }
 0x150   : > { %v375_v36 = vpop.xlane.xlu1 %374  ;;  %v351_v21 = vpop.xlane.xlu0 %350 }
 0x151   : > { %v1844_v37 = vsub.f32 %v1762_v25, %v390_v32  ;;  %v1847_v20 = vsub.f32 %v1759_v24, %v390_v32  ;;  %v383_v38 = vadd.f32 %v375_v36, %v351_v21  ;;  %v463_v39 = vsel %vm327_vm0, %v445_v34, 0.0  ;;  %v1877_v34 = vld [vmem:[#allocation7 + $0x2] ss:$0 sm:$0xff] }
 0x152   : > { %461 = vadd.xlane.f32.xlu1 %v460_v31  ;;  %429 = vadd.xlane.f32.xlu0 %v428_v33  ;;  %v431_v41 = vsel %vm327_vm0, %v413_v35, 0.0  ;;  %v1875_v33 = vld [vmem:[#allocation7 + $0x3] ss:$0 sm:$0xff] }
 0x153   : > { %v391_v40 = vmul.f32 0.0625, %v383_v38  ;;  %v446_v46 = vmul.f32 %v1847_v20, %v1847_v20  ;;  %v414_v47 = vmul.f32 %v1844_v37, %v1844_v37 }
 0x155   : > { %v1856_v25 = vsub.f32 %v1772_v29, %v391_v40  ;;  %v1859_v24 = vsub.f32 %v1769_v28, %v391_v40  ;;  %v466_v48 = vsel %vm327_vm0, %v446_v46, 0.0  ;;  %v434_v49 = vsel %vm327_vm0, %v414_v47, 0.0  ;;  %v573_v28 = vld [vmem:[#allocation8 + $0x8] sm:$0xff] }
 0x156   : > { %464 = vadd.xlane.f32.xlu1 %v463_v39  ;;  %432 = vadd.xlane.f32.xlu0 %v431_v41 }
 0x157   : > { %v447_v50 = vmul.f32 %v1859_v24, %v1859_v24  ;;  %v415_v51 = vmul.f32 %v1856_v25, %v1856_v25  ;;  %1054 = vmatprep.subr.mxu1 %v573_v28 }
 0x158   : > { %1055 = vmatpush3.msra.mxu1 %v573_v28 }
 0x159   : > { %v469_v29 = vsel %vm327_vm0, %v447_v50, 0.0  ;;  %v437_v52 = vsel %vm327_vm0, %v415_v51, 0.0 }
 0x15a   : > { %467 = vadd.xlane.f32.xlu1 %v466_v48  ;;  %435 = vadd.xlane.f32.xlu0 %v434_v49 }
 0x15e   : > { %470 = vadd.xlane.f32.xlu1 %v469_v29  ;;  %438 = vadd.xlane.f32.xlu0 %v437_v52 }
 0x1cf   : > { %v450_v54 = vpop.xlane.xlu1 %449  ;;  %v418_v55 = vpop.xlane.xlu0 %417 }
 0x1d0   : > { %v472_v56 = vadd.f32 %v450_v54, %v418_v55 }
 0x1d2   : > { %v480_v59 = vmul.f32 0.0625, %v472_v56 }
 0x1d3   : > { %v453_v60 = vpop.xlane.xlu1 %452  ;;  %v421_v61 = vpop.xlane.xlu0 %420 }
 0x1d4   : > { %v488_v62 = vadd.f32 1e-05, %v480_v59  ;;  %v473_v63 = vadd.f32 %v453_v60, %v421_v61 }
 0x1d6   : > { %1183 = vrsqrt.f32 %v488_v62  ;;  %v481_v0 = vmul.f32 0.0625, %v473_v63 }
 0x1d7   : > { %v456_v3 = vpop.xlane.xlu1 %455  ;;  %v424_v4 = vpop.xlane.xlu0 %423 }
 0x1d8   : > { %v489_v5 = vadd.f32 1e-05, %v481_v0  ;;  %v474_v6 = vadd.f32 %v456_v3, %v424_v4 }
 0x1da   : > { %1185 = vrsqrt.f32 %v489_v5  ;;  %v482_v7 = vmul.f32 0.0625, %v474_v6 }
 0x1db   : > { %v459_v8 = vpop.xlane.xlu1 %458  ;;  %v427_v9 = vpop.xlane.xlu0 %426 }
 0x1dc   : > { %v490_v10 = vadd.f32 1e-05, %v482_v7  ;;  %v475_v11 = vadd.f32 %v459_v8, %v427_v9 }
 0x1de   : > { %1187 = vrsqrt.f32 %v490_v10  ;;  %v483_v14 = vmul.f32 0.0625, %v475_v11 }
 0x1df   : > { %v462_v15 = vpop.xlane.xlu1 %461  ;;  %v430_v18 = vpop.xlane.xlu0 %429 }
 0x1e0   : > { %v1184_v19 = vpop.eup %1183  ;;  %v491_v22 = vadd.f32 1e-05, %v483_v14  ;;  %v476_v23 = vadd.f32 %v462_v15, %v430_v18 }
 0x1e1   : > { %v540_v30 = vmul.f32 %v1184_v19, %v1784_v45  ;;  %v508_v31 = vmul.f32 %v1184_v19, %v1782_v44 }
 0x1e2   : > { %1189 = vrsqrt.f32 %v491_v22  ;;  %v484_v32 = vmul.f32 0.0625, %v476_v23 }
 0x1e3   : > { %v465_v35 = vpop.xlane.xlu1 %464  ;;  %v433_v36 = vpop.xlane.xlu0 %432  ;;  %v552_v21 = vmul.f32 %v1869_v26, %v540_v30  ;;  %v520_v38 = vmul.f32 %v1871_v17, %v508_v31 }
 0x1e4   : > { %v1186_v39 = vpop.eup %1185  ;;  %v492_v40 = vadd.f32 1e-05, %v484_v32  ;;  %v477_v41 = vadd.f32 %v465_v35, %v433_v36 }
 0x1e5   : > { %v564_v46 = vadd.f32 %v1875_v33, %v552_v21  ;;  %v532_v45 = vadd.f32 %v1877_v34, %v520_v38  ;;  %v541_v44 = vmul.f32 %v1186_v39, %v1780_v43  ;;  %v509_v47 = vmul.f32 %v1186_v39, %v1778_v42 }
 0x1e6   : > { %1191 = vrsqrt.f32 %v492_v40  ;;  %v485_v48 = vmul.f32 0.0625, %v477_v41 }
 0x1e7   : > { %v468_v49 = vpop.xlane.xlu1 %467  ;;  %1056 = vmatprep.mubr.msk.f32.mxu1 %vm327_vm0, %v564_v46  ;;  %1070 = vmatprep.mubr.msk.f32.mxu0 %vm327_vm0, %v532_v45  ;;  %v436_v50 = vpop.xlane.xlu0 %435  ;;  %v553_v51 = vmul.f32 %v1869_v26, %v541_v44  ;;  %v521_v29 = vmul.f32 %v1871_v17, %v509_v47 }
 0x1e8   : > { %v1188_v52 = vpop.eup %1187  ;;  %v493_v28 = vadd.f32 1e-05, %v485_v48  ;;  %v478_v53 = vadd.f32 %v468_v49, %v436_v50 }
 0x1e9   : > { %v565_v54 = vadd.f32 %v1875_v33, %v553_v51  ;;  %v533_v43 = vadd.f32 %v1877_v34, %v521_v29  ;;  %v542_v42 = vmul.f32 %v1188_v52, %v1799_v58  ;;  %v510_v55 = vmul.f32 %v1188_v52, %v1796_v57 }
 0x1ea   : > { %1193 = vrsqrt.f32 %v493_v28  ;;  %v486_v56 = vmul.f32 0.0625, %v478_v53 }
 0x1eb   : > { %v471_v59 = vpop.xlane.xlu1 %470  ;;  %1057 = vmatmul.mubr.msk.f32.vlgmr.msra.gmra.mrb[0].mxu1 %vm327_vm0, %v565_v54  ;;  %1071 = vmatmul.mubr.msk.f32.vlgmr.msra.gmra.mrb[0].mxu0 %vm327_vm0, %v533_v43  ;;  %v439_v60 = vpop.xlane.xlu0 %438  ;;  %v554_v61 = vmul.f32 %v1869_v26, %v542_v42  ;;  %v522_v62 = vmul.f32 %v1871_v17, %v510_v55 }
 0x1ec   : > { %v1190_v63 = vpop.eup %1189  ;;  %v494_v0 = vadd.f32 1e-05, %v486_v56  ;;  %v479_v3 = vadd.f32 %v471_v59, %v439_v60 }
 0x1ed   : > { %v566_v4 = vadd.f32 %v1875_v33, %v554_v61  ;;  %v534_v58 = vadd.f32 %v1877_v34, %v522_v62  ;;  %v543_v57 = vmul.f32 %v1190_v63, %v1810_v2  ;;  %v511_v5 = vmul.f32 %v1190_v63, %v1807_v1 }
 0x1ee   : > { %1195 = vrsqrt.f32 %v494_v0  ;;  %v487_v6 = vmul.f32 0.0625, %v479_v3 }
 0x1ef   : > { %1059 = vmatprep.mubr.msk.f32.mxu1 %vm327_vm0, %v566_v4  ;;  %1073 = vmatprep.mubr.msk.f32.mxu0 %vm327_vm0, %v534_v58  ;;  %v555_v7 = vmul.f32 %v1869_v26, %v543_v57  ;;  %v523_v8 = vmul.f32 %v1871_v17, %v511_v5 }
 0x1f0   : > { %v1192_v9 = vpop.eup %1191  ;;  %v495_v10 = vadd.f32 1e-05, %v487_v6 }
 0x1f1   : > { %v567_v11 = vadd.f32 %v1875_v33, %v555_v7  ;;  %v535_v14 = vadd.f32 %v1877_v34, %v523_v8  ;;  %v544_v2 = vmul.f32 %v1192_v9, %v1823_v13  ;;  %v512_v1 = vmul.f32 %v1192_v9, %v1820_v12 }
 0x1f2   : > { %1197 = vrsqrt.f32 %v495_v10 }
 0x1f3   : > { %1060 = vmatmul.mubr.msk.f32.gmra.mrb[2].mxu1 %vm327_vm0, %v567_v11  ;;  %1074 = vmatmul.mubr.msk.f32.gmra.mrb[2].mxu0 %vm327_vm0, %v535_v14  ;;  %v556_v15 = vmul.f32 %v1869_v26, %v544_v2  ;;  %v524_v18 = vmul.f32 %v1871_v17, %v512_v1 }
 0x1f4   : > { %v1194_v19 = vpop.eup %1193 }
 0x1f5   : > { %v568_v22 = vadd.f32 %v1875_v33, %v556_v15  ;;  %v536_v23 = vadd.f32 %v1877_v34, %v524_v18  ;;  %v545_v30 = vmul.f32 %v1194_v19, %v1835_v16  ;;  %v513_v13 = vmul.f32 %v1194_v19, %v1832_v27 }
 0x1f7   : > { %1062 = vmatprep.mubr.msk.f32.mxu1 %vm327_vm0, %v568_v22  ;;  %1076 = vmatprep.mubr.msk.f32.mxu0 %vm327_vm0, %v536_v23  ;;  %v557_v12 = vmul.f32 %v1869_v26, %v545_v30  ;;  %v525_v31 = vmul.f32 %v1871_v17, %v513_v13 }
 0x1f8   : > { %v1196_v32 = vpop.eup %1195 }
 0x1f9   : > { %v569_v35 = vadd.f32 %v1875_v33, %v557_v12  ;;  %v537_v36 = vadd.f32 %v1877_v34, %v525_v31  ;;  %v546_v21 = vmul.f32 %v1196_v32, %v1847_v20  ;;  %v514_v38 = vmul.f32 %v1196_v32, %v1844_v37 }
 0x1fb   : > { %1063 = vmatmul.mubr.msk.f32.gmra.mrb[4].mxu1 %vm327_vm0, %v569_v35  ;;  %1077 = vmatmul.mubr.msk.f32.gmra.mrb[4].mxu0 %vm327_vm0, %v537_v36  ;;  %v558_v27 = vmul.f32 %v1869_v26, %v546_v21  ;;  %v526_v16 = vmul.f32 %v1871_v17, %v514_v38 }
 0x1fc   : > { %v1198_v39 = vpop.eup %1197 }
 0x1fd   : > { %v570_v40 = vadd.f32 %v1875_v33, %v558_v27  ;;  %v538_v41 = vadd.f32 %v1877_v34, %v526_v16  ;;  %v547_v46 = vmul.f32 %v1198_v39, %v1859_v24  ;;  %v515_v45 = vmul.f32 %v1198_v39, %v1856_v25 }
 0x1ff   : > { %1065 = vmatprep.mubr.msk.f32.mxu1 %vm327_vm0, %v570_v40  ;;  %1079 = vmatprep.mubr.msk.f32.mxu0 %vm327_vm0, %v538_v41  ;;  %v559_v37 = vmul.f32 %v1869_v26, %v547_v46  ;;  %v527_v20 = vmul.f32 %v1871_v17, %v515_v45 }
 0x201   : > { %v571_v44 = vadd.f32 %v1875_v33, %v559_v37  ;;  %v539_v47 = vadd.f32 %v1877_v34, %v527_v20 }
 0x203   : > { %1066 = vmatmul.mubr.msk.f32.gmra.mrb[6].mxu1 %vm327_vm0, %v571_v44  ;;  %1080 = vmatmul.mubr.msk.f32.gmra.mrb[6].mxu0 %vm327_vm0, %v539_v47 }
 0x2be   : > { %v1058_v24 = vpop.f32.mrb[0].mxu1  ;;  %v1072_v48 = vpop.f32.mrb[0].mxu0 }
 0x2bf   : > { %v799_v25 = vadd.f32 %v1072_v48, %v1058_v24  ;;  %v664_v49 = vpop.f32.mrb[1].mxu1  ;;  %v793_v50 = vpop.f32.mrb[1].mxu0 }
 0x2c0   : > { %v794_v51 = vadd.f32 %v793_v50, %v664_v49 }
 0x2c1   : > { %834 = vst.msk [vmem:[%s307_s21 + $0x8] sm:$0xff] %vm832_vm1, %v799_v25 }
 0x2c2   : > { %833 = vst.msk [vmem:[%s307_s21] sm:$0xff] %vm832_vm1, %v794_v51 }
 0x2c6   : > { %v1061_v26 = vpop.f32.mrb[2].mxu1  ;;  %v1075_v17 = vpop.f32.mrb[2].mxu0 }
 0x2c7   : > { %v809_v33 = vadd.f32 %v1075_v17, %v1061_v26  ;;  %v674_v34 = vpop.f32.mrb[3].mxu1  ;;  %v803_v29 = vpop.f32.mrb[3].mxu0 }
 0x2c8   : > { %v804_v52 = vadd.f32 %v803_v29, %v674_v34 }
 0x2c9   : > { %836 = vst.msk [vmem:[%s307_s21 + $0x18] sm:$0xff] %vm832_vm1, %v809_v33 }
 0x2ca   : > { %835 = vst.msk [vmem:[%s307_s21 + $0x10] sm:$0xff] %vm832_vm1, %v804_v52 }
 0x2ce   : > { %v1064_v28 = vpop.f32.mrb[4].mxu1  ;;  %v1078_v53 = vpop.f32.mrb[4].mxu0 }
 0x2cf   : > { %v819_v54 = vadd.f32 %v1078_v53, %v1064_v28  ;;  %v684_v43 = vpop.f32.mrb[5].mxu1  ;;  %v813_v42 = vpop.f32.mrb[5].mxu0 }
 0x2d0   : > { %v814_v55 = vadd.f32 %v813_v42, %v684_v43 }
 0x2d1   : > { %838 = vst.msk [vmem:[%s307_s21 + $0x28] sm:$0xff] %vm832_vm1, %v819_v54 }
 0x2d2   : > { %837 = vst.msk [vmem:[%s307_s21 + $0x20] sm:$0xff] %vm832_vm1, %v814_v55 }
 0x2d6   : > { %v1067_v56 = vpop.f32.mrb[6].mxu1  ;;  %v1081_v59 = vpop.f32.mrb[6].mxu0 }
 0x2d7   : > { %v829_v60 = vadd.f32 %v1081_v59, %v1067_v56  ;;  %v694_v61 = vpop.f32.mrb[7].mxu1  ;;  %v823_v62 = vpop.f32.mrb[7].mxu0 }
 0x2d8   : > { %v824_v63 = vadd.f32 %v823_v62, %v694_v61 }
 0x2d9   : > { %840 = vst.msk [vmem:[%s307_s21 + $0x38] sm:$0xff] %vm832_vm1, %v829_v60 }
 0x2da   : > { %839 = vst.msk [vmem:[%s307_s21 + $0x30] sm:$0xff] %vm832_vm1, %v824_v63 }
 0x2db   : > { %1329 = shalt.err (!%p1326_p1)
}
 0x2dc   : > { %s1330_s0 = scalar_lea.hbm %s1952_s22, 1024  ;;  %s1334_s8 = scalar_lea.hbm %s2009_s4, 2048 }
 0x2dd   : > { %p1331_p8 = scmp.ne.s32.totalorder %s1952_s22, %s1330_s0  ;;  %p1335_p0 = scmp.lt.u32.totalorder %s1952_s22, %s2009_s4 }
 0x2de   : > { %p1336_p6 = scmp.lt.u32.totalorder %s1334_s8, %s1330_s0  ;;  %p1338_p9 = scmp.lt.u32.totalorder %s1330_s0, %s1952_s22 }
 0x2df   : > { %p1332_p10 = pnand %p1331_p8, %p2049_p13 }
 0x2e0   : > { %p1337_p3 = por %p1336_p6, %p1335_p0 }
 0x2e1   : > { %p1333_p7 = pneg %p1332_p10 }
 0x2e2   : > { %p1339_p4 = por %p1338_p9, %p1337_p3 }
 0x2e4   : > { %p1340_p5 = pnand %p1339_p4, %p1333_p7 }
 0x2e6   : > { %1343 = shalt.err (!%p1340_p5)
}
 0x2e7   : > { %s1420_s9 = smov 128   ;;  %s1421_s3 = smov 8  }
 0x2e8   : > { %1102 = dma.vmem_to_hbm [thread:$0]  (%p2049_p13), %s1954_s23, 1024, %s1952_s22, %s842_s18, %s1420_s9, %s1420_s9, %s1421_s3  }
 0x2e9 PF: > { %s2050_s28 = sld [smem:[#allocation16_spill]]  ;;  %s872_s11 = sand.u32 1, %s1390_s15  }
 0x2ea   : > { %p2052_p12 = scmp.ge.s32.totalorder %s1410_s20, 2  ;;  %s873_s21 = scalar_lea.sflag [#allocation4], %s872_s11 }
 0x2ef   : > { %p2051_p2 = scmp.ne.s32.totalorder %s2050_s28, 0 }
 0x2f1   : > { %p1119_p11 = pnand %p2052_p12, %p2051_p2 }
 0x2f3   : > { %1385 = dma.done.wait (!%p1119_p11), %s873_s21, 1024  }
 0x2f4   : > { %1387 = vsyncadd (!%p1119_p11), %s873_s21, 4294966272  ;;  %s24_s20 = sadd.s32 1, %s1410_s20   ;;  %s2053_s26 = sld [smem:[#allocation17_spill]] }
 0x2f5   : > { %p21_p1 = scmp.ge.s32.totalorder %s24_s20, 4   ;;  %s2054_s15 = smov %s1394_s16 }
 0x2f6   : > { %s2055_s16 = smov %s1398_s17  ;;  %s2056_s17 = smov %s1640_s10 }
 0x2f7   : > { %s2057_s18 = smov %s1406_s19  ;;  %23 = sbr.rel (!%p21_p1) target bundleno = 13 (0xd), region = 102 }
 0x2fa   : > { %s2058_s19 = smov %s2053_s26 }
 0x2fe   :  { %878 = vsyncpa [#allocation3], 1 }
 0x2ff   :  { %880 = vsyncpa [#allocation3 + $0x1], 1 }
 0x300   :  { %881 = vsyncpa [#allocation6], 1 }
 0x301   :  { %883 = vsyncpa [#allocation6 + $0x1], 1 }
 0x302   :  { %884 = vsyncpa [#allocation9], 1 }
 0x303   :  { %885 = vsyncpa [#allocation4], 1 }
 0x304   :  { %887 = vsyncpa [#allocation4 + $0x1], 1 }

</bundles_post_ra>
